<compile_context>
chip_gen: v7x
topology: tpu7x:2x2x1
jax: 0.10.0
libtpu: 0.0.40
codegen_flags: <defaults>
</compile_context>

<pallas_src>
import jax
import jax.numpy as jnp
from jax.experimental import pallas as pl
from jax.experimental.pallas import tpu as pltpu


def _round_up(n, m):
    return ((n + m - 1) // m) * m


def dqn_kernel(x_ref, w1_ref, b1_ref, w2_ref, b2_ref, w3_ref, b3_ref, o_ref):
    # Whole 3-layer MLP for one batch tile, fused in a single kernel.
    # Dots accumulate in f32 on the MXU; bias-add / ReLU stay in f32 (VPU).
    x = x_ref[...]
    h1 = jnp.dot(x, w1_ref[...], preferred_element_type=jnp.float32) + b1_ref[...]
    h1 = jnp.maximum(h1, 0.0)
    h2 = jnp.dot(
        h1.astype(w2_ref.dtype), w2_ref[...], preferred_element_type=jnp.float32
    ) + b2_ref[...]
    h2 = jnp.maximum(h2, 0.0)
    o_ref[...] = (
        jnp.dot(h2.astype(w3_ref.dtype), w3_ref[...],
                preferred_element_type=jnp.float32)
        + b3_ref[...]
    ).astype(o_ref.dtype)


def dqn_forward(x, params, *, block_batch=512, cast_mxu_inputs_bf16=False):
    """x: [B, state_size] float32. params: dict of (w1,b1,w2,b2,w3,b3).

    Returns [B, action_size] float32 Q-values.
    """
    w1, b1, w2, b2, w3, b3 = (
        params["w1"], params["b1"], params["w2"],
        params["b2"], params["w3"], params["b3"],
    )
    B, S = x.shape
    H = w1.shape[1]
    A = w3.shape[1]

    # --- Lane-dense output: pad fc3 output columns to a multiple of 128 with
    # exact zeros; wrapper slices [:, :A] afterwards so no garbage Q-values leak.
    A_pad = _round_up(A, 128)
    if A_pad != A:
        w3 = jnp.pad(w3, ((0, 0), (0, A_pad - A)))
        b3 = jnp.pad(b3, ((0, 0), (0, A_pad - A)))

    # --- Batch tile: as large as requested, but never bigger than the
    # (8-aligned) batch itself. Pad the batch to a multiple of the tile.
    bb = min(_round_up(block_batch, 8), _round_up(B, 8))
    B_pad = _round_up(B, bb)
    if B_pad != B:
        x = jnp.pad(x, ((0, B_pad - B), (0, 0)))

    grid = (B_pad // bb,)

    if cast_mxu_inputs_bf16:
        # bf16 MXU inputs (v6e/v7x fast path), f32 accumulation preserved by
        # preferred_element_type=f32 in the kernel. Biases stay f32.
        x = x.astype(jnp.bfloat16)
        w1 = w1.astype(jnp.bfloat16)
        w2 = w2.astype(jnp.bfloat16)
        w3 = w3.astype(jnp.bfloat16)

    bytes_per = jnp.dtype(x.dtype).itemsize
    cost = pl.CostEstimate(
        flops=2 * B_pad * (S * H + H * H + H * A_pad),
        transcendentals=0,
        bytes_accessed=int(
            B_pad * S * bytes_per                      # x
            + (S * H + H * H + H * A_pad) * bytes_per  # weights
            + (H + H + A_pad) * 4                      # biases (f32)
            + B_pad * A_pad * 4                        # output (f32)
        ),
    )

    out = pl.pallas_call(
        dqn_kernel,
        out_shape=jax.ShapeDtypeStruct((B_pad, A_pad), jnp.float32),
        grid_spec=pltpu.PrefetchScalarGridSpec(
            num_scalar_prefetch=0,
            grid=grid,
            in_specs=[
                pl.BlockSpec((bb, S), lambda i: (i, 0)),      # x tile
                pl.BlockSpec((S, H), lambda i: (0, 0)),       # w1 (resident)
                pl.BlockSpec((1, H), lambda i: (0, 0)),       # b1
                pl.BlockSpec((H, H), lambda i: (0, 0)),       # w2
                pl.BlockSpec((1, H), lambda i: (0, 0)),       # b2
                pl.BlockSpec((H, A_pad), lambda i: (0, 0)),   # w3 (padded cols)
                pl.BlockSpec((1, A_pad), lambda i: (0, 0)),   # b3 (padded cols)
            ],
            out_specs=pl.BlockSpec((bb, A_pad), lambda i: (i, 0)),
        ),
        compiler_params=pltpu.CompilerParams(
            dimension_semantics=("parallel",),  # batch tiles shard across TCs (v7x)
        ),
        cost_estimate=cost,
    )(x, w1, b1, w2, b2, w3, b3)

    return out[:B, :A]


def init_params(key, state_size, action_size, hidden_size=64):
    """Deterministic init mimicking PyTorch nn.Linear (uniform +/- 1/sqrt(fan_in))."""
    ks = jax.random.split(key, 6)

    def linear(kw, kb, fan_in, fan_out):
        bound = 1.0 / jnp.sqrt(jnp.float32(fan_in))
        w = jax.random.uniform(kw, (fan_in, fan_out), jnp.float32, -bound, bound)
        b = jax.random.uniform(kb, (1, fan_out), jnp.float32, -bound, bound)
        return w, b

    w1, b1 = linear(ks[0], ks[1], state_size, hidden_size)
    w2, b2 = linear(ks[2], ks[3], hidden_size, hidden_size)
    w3, b3 = linear(ks[4], ks[5], hidden_size, action_size)
    return {"w1": w1, "b1": b1, "w2": w2, "b2": b2, "w3": w3, "b3": b3}


def dqn_reference(x, params):
    h1 = jnp.maximum(x @ params["w1"] + params["b1"], 0.0)
    h2 = jnp.maximum(h1 @ params["w2"] + params["b2"], 0.0)
    return h2 @ params["w3"] + params["b3"]


if __name__ == "__main__":
    key = jax.random.PRNGKey(0)
    k_params, k_x = jax.random.split(key)

    batch = 16
    state_size = 16     # e.g. a flattened 4x4 gridworld one-hot state
    action_size = 4     # up / down / left / right
    hidden_size = 64

    params = init_params(k_params, state_size, action_size, hidden_size)
    x = jax.random.normal(k_x, (batch, state_size), jnp.float32)

    # f32 path (default): exact vs. reference within tight tolerances.
    out = dqn_forward(x, params)
    out = jax.block_until_ready(out)

    ref = dqn_reference(x, params)
    assert out.shape == (batch, action_size)
    assert jnp.allclose(out, ref, atol=1e-5, rtol=1e-5), "mismatch vs JAX reference"

    # Also exercise an odd batch (tests cdiv/padding path) and the bf16 MXU path.
    x_odd = jax.random.normal(jax.random.PRNGKey(1), (13, state_size), jnp.float32)
    out_odd = jax.block_until_ready(dqn_forward(x_odd, params))
    assert out_odd.shape == (13, action_size)
    assert jnp.allclose(out_odd, dqn_reference(x_odd, params), atol=1e-5, rtol=1e-5)

    out_bf16 = jax.block_until_ready(
        dqn_forward(x, params, cast_mxu_inputs_bf16=True)
    )
    assert jnp.allclose(out_bf16, ref, atol=5e-2, rtol=5e-2), "bf16 path mismatch"

    print("KERNEL_OK")
</pallas_src>

<mosaic_0001>
module attributes {stable_mosaic.version = 11 : i64} {
  func.func @dqn_kernel(%arg0: i32, %arg1: memref<16x16xf32, #tpu.memory_space<vmem>>, %arg2: memref<16x64xf32, #tpu.memory_space<vmem>>, %arg3: memref<1x64xf32, #tpu.memory_space<vmem>>, %arg4: memref<64x64xf32, #tpu.memory_space<vmem>>, %arg5: memref<1x64xf32, #tpu.memory_space<vmem>>, %arg6: memref<64x128xf32, #tpu.memory_space<vmem>>, %arg7: memref<1x128xf32, #tpu.memory_space<vmem>>, %arg8: memref<16x128xf32, #tpu.memory_space<vmem>>) attributes {dimension_semantics = [#tpu.dimension_semantics<parallel>], iteration_bounds = array<i64: 1>, scalar_prefetch = 0 : i64, scratch_operands = 0 : i64, tpu.core_type = #tpu.core_type<tc>, window_params = [{transform_indices = @transform_0, window_bounds = array<i64: 16, 16>}, {pipeline_mode = #tpu.pipeline_mode<synchronous>, transform_indices = @transform_1, window_bounds = array<i64: 16, 64>}, {pipeline_mode = #tpu.pipeline_mode<synchronous>, transform_indices = @transform_2, window_bounds = array<i64: 1, 64>}, {pipeline_mode = #tpu.pipeline_mode<synchronous>, transform_indices = @transform_3, window_bounds = array<i64: 64, 64>}, {pipeline_mode = #tpu.pipeline_mode<synchronous>, transform_indices = @transform_4, window_bounds = array<i64: 1, 64>}, {pipeline_mode = #tpu.pipeline_mode<synchronous>, transform_indices = @transform_5, window_bounds = array<i64: 64, 128>}, {pipeline_mode = #tpu.pipeline_mode<synchronous>, transform_indices = @transform_6, window_bounds = array<i64: 1, 128>}, {transform_indices = @transform_7, window_bounds = array<i64: 16, 128>}]} {
    %c0 = arith.constant 0 : index
    %c0_0 = arith.constant 0 : index
    %0 = vector.load %arg1[%c0, %c0_0] : memref<16x16xf32, #tpu.memory_space<vmem>>, vector<16x16xf32>
    %c0_1 = arith.constant 0 : index
    %c0_2 = arith.constant 0 : index
    %1 = vector.load %arg2[%c0_1, %c0_2] : memref<16x64xf32, #tpu.memory_space<vmem>>, vector<16x64xf32>
    %cst = arith.constant dense<0.000000e+00> : vector<16x64xf32>
    %2 = tpu.matmul %0, %1, %cst {dimension_numbers = #tpu.dot_dimension_numbers<[1], [0], [0], [1], [0, 0, 1, 1], [], []>} : vector<16x16xf32>, vector<16x64xf32>, vector<16x64xf32> -> vector<16x64xf32>
    %c0_3 = arith.constant 0 : index
    %c0_4 = arith.constant 0 : index
    %3 = vector.load %arg3[%c0_3, %c0_4] : memref<1x64xf32, #tpu.memory_space<vmem>>, vector<1x64xf32>
    %4 = vector.broadcast %3 : vector<1x64xf32> to vector<16x64xf32>
    %5 = arith.addf %2, %4 : vector<16x64xf32>
    %cst_5 = arith.constant 0.000000e+00 : f32
    %6 = vector.broadcast %cst_5 : f32 to vector<16x64xf32>
    %7 = arith.maximumf %5, %6 : vector<16x64xf32>
    %c0_6 = arith.constant 0 : index
    %c0_7 = arith.constant 0 : index
    %8 = vector.load %arg4[%c0_6, %c0_7] : memref<64x64xf32, #tpu.memory_space<vmem>>, vector<64x64xf32>
    %cst_8 = arith.constant dense<0.000000e+00> : vector<16x64xf32>
    %9 = tpu.matmul %7, %8, %cst_8 {dimension_numbers = #tpu.dot_dimension_numbers<[1], [0], [0], [1], [0, 0, 1, 1], [], []>} : vector<16x64xf32>, vector<64x64xf32>, vector<16x64xf32> -> vector<16x64xf32>
    %c0_9 = arith.constant 0 : index
    %c0_10 = arith.constant 0 : index
    %10 = vector.load %arg5[%c0_9, %c0_10] : memref<1x64xf32, #tpu.memory_space<vmem>>, vector<1x64xf32>
    %11 = vector.broadcast %10 : vector<1x64xf32> to vector<16x64xf32>
    %12 = arith.addf %9, %11 : vector<16x64xf32>
    %cst_11 = arith.constant 0.000000e+00 : f32
    %13 = vector.broadcast %cst_11 : f32 to vector<16x64xf32>
    %14 = arith.maximumf %12, %13 : vector<16x64xf32>
    %c0_12 = arith.constant 0 : index
    %c0_13 = arith.constant 0 : index
    %15 = vector.load %arg6[%c0_12, %c0_13] : memref<64x128xf32, #tpu.memory_space<vmem>>, vector<64x128xf32>
    %cst_14 = arith.constant dense<0.000000e+00> : vector<16x128xf32>
    %16 = tpu.matmul %14, %15, %cst_14 {dimension_numbers = #tpu.dot_dimension_numbers<[1], [0], [0], [1], [0, 0, 1, 1], [], []>} : vector<16x64xf32>, vector<64x128xf32>, vector<16x128xf32> -> vector<16x128xf32>
    %c0_15 = arith.constant 0 : index
    %c0_16 = arith.constant 0 : index
    %17 = vector.load %arg7[%c0_15, %c0_16] : memref<1x128xf32, #tpu.memory_space<vmem>>, vector<1x128xf32>
    %18 = vector.broadcast %17 : vector<1x128xf32> to vector<16x128xf32>
    %19 = arith.addf %16, %18 : vector<16x128xf32>
    %c0_17 = arith.constant 0 : index
    %c0_18 = arith.constant 0 : index
    %20 = vector.load %arg8[%c0_17, %c0_18] : memref<16x128xf32, #tpu.memory_space<vmem>>, vector<16x128xf32>
    tpu.vector_store %arg8[%c0_17, %c0_18], %19 {strides = array<i32>} : memref<16x128xf32, #tpu.memory_space<vmem>>, vector<16x128xf32>,
    return
  }
  func.func @transform_0(%arg0: i32) -> (i32, i32) {
    %c0_i32 = arith.constant 0 : i32
    %c0_i32_0 = arith.constant 0 : i32
    return %arg0, %c0_i32 : i32, i32
  }
  func.func @transform_1(%arg0: i32) -> (i32, i32) {
    %c0_i32 = arith.constant 0 : i32
    %c0_i32_0 = arith.constant 0 : i32
    %c0_i32_1 = arith.constant 0 : i32
    return %c0_i32, %c0_i32_0 : i32, i32
  }
  func.func @transform_2(%arg0: i32) -> (i32, i32) {
    %c0_i32 = arith.constant 0 : i32
    %c0_i32_0 = arith.constant 0 : i32
    %c0_i32_1 = arith.constant 0 : i32
    return %c0_i32, %c0_i32_0 : i32, i32
  }
  func.func @transform_3(%arg0: i32) -> (i32, i32) {
    %c0_i32 = arith.constant 0 : i32
    %c0_i32_0 = arith.constant 0 : i32
    %c0_i32_1 = arith.constant 0 : i32
    return %c0_i32, %c0_i32_0 : i32, i32
  }
  func.func @transform_4(%arg0: i32) -> (i32, i32) {
    %c0_i32 = arith.constant 0 : i32
    %c0_i32_0 = arith.constant 0 : i32
    %c0_i32_1 = arith.constant 0 : i32
    return %c0_i32, %c0_i32_0 : i32, i32
  }
  func.func @transform_5(%arg0: i32) -> (i32, i32) {
    %c0_i32 = arith.constant 0 : i32
    %c0_i32_0 = arith.constant 0 : i32
    %c0_i32_1 = arith.constant 0 : i32
    return %c0_i32, %c0_i32_0 : i32, i32
  }
  func.func @transform_6(%arg0: i32) -> (i32, i32) {
    %c0_i32 = arith.constant 0 : i32
    %c0_i32_0 = arith.constant 0 : i32
    %c0_i32_1 = arith.constant 0 : i32
    return %c0_i32, %c0_i32_0 : i32, i32
  }
  func.func @transform_7(%arg0: i32) -> (i32, i32) {
    %c0_i32 = arith.constant 0 : i32
    %c0_i32_0 = arith.constant 0 : i32
    return %arg0, %c0_i32 : i32, i32
  }
}

</mosaic_0001>

<bundles_post_ra>
// kernel: tpu_custom_call.1
= control target key start
LH: loop header
LB: loop body
LE: loop exit
PB: predicated region body
PF: predicated region fallthrough
CT: control target
= control target key end

     0   :  { %12 = vsyncpa [#allocation3], 0  ;;  %s783_s0 = inlined_call_operand.hbm [shape: f32[16,16], index: 0, kind: input, shape index: {}]   ;;  %s784_s1 = inlined_call_operand.hbm [shape: f32[16,64], index: 1, kind: input, shape index: {}]   ;;  %s785_s2 = inlined_call_operand.vmem [shape: f32[1,64], index: 2, kind: input, shape index: {}]   ;;  %s786_s3 = inlined_call_operand.hbm [shape: f32[64,64], index: 3, kind: input, shape index: {}]   ;;  %s787_s4 = inlined_call_operand.vmem [shape: f32[1,64], index: 4, kind: input, shape index: {}]   ;;  %s788_s5 = inlined_call_operand.hbm [shape: f32[64,128], index: 5, kind: input, shape index: {}]   ;;  %s789_s6 = inlined_call_operand.vmem [shape: f32[1,128], index: 6, kind: input, shape index: {}]   ;;  %s790_s7 = inlined_call_operand.hbm [shape: f32[16,128], index: 7, kind: output, shape index: {}]  }
   0x1   :  { %13 = vsyncpa [#allocation6], 0 }
   0x2   :  { %14 = vsyncpa [#allocation9], 0 }
   0x3   :  { %15 = vsyncpa [#allocation4], 0  ;;  %s632_s24 = smov [#allocation5]   ;;  %s633_s26 = smov [#allocation2]  }
   0x4   :  { %s33_s25 = sshll.u32 %s632_s24, 4  ;;  %s21_s27 = sshll.u32 %s633_s26, 4  ;;  %s34_s25 = int_to_ptr.vmem [resolvable:$true] %s33_s25  ;;  %s679_s27 = int_to_ptr.vmem [resolvable:$true] %s21_s27 }
   0x5   :  { %s514_s30 = scalar_lea.hbm %s784_s1, 256 }
   0x6   :  { %p515_p0 = scmp.ne.s32.totalorder %s784_s1, %s514_s30  ;;  %p518_p1 = scmp.lt.u32.totalorder %s514_s30, %s784_s1 }
   0x8   :  { %p520_p2 = pnand %p518_p1, %p515_p0 }
   0xa   :  { %523 = shalt.err (!%p520_p2)
}
   0xb   :  { %s524_s12 = scalar_lea.vmem %s34_s25, 256  ;;  %p529_p4 = scmp.lt.s32.totalorder %s34_s25, %s34_s25 }
   0xc   :  { %p525_p3 = scmp.ne.s32.totalorder %s34_s25, %s524_s12  ;;  %p530_p5 = scmp.lt.s32.totalorder %s524_s12, %s524_s12 }
   0xe   :  { %p531_p6 = por %p530_p5, %p529_p4 }
  0x10   :  { %p532_p7 = pnand %p531_p6, %p525_p3 }
  0x12   :  { %535 = shalt.err (!%p532_p7)
}
  0x13   :  { %s634_s13 = smov 128   ;;  %s635_s14 = smov 8  }
  0x14   :  { %39 = dma.hbm_to_vmem [thread:$0]  %s784_s1, 256, %s34_s25, [#allocation6], %s634_s13, %s634_s13, %s635_s14  }
  0x15   :  { %s536_s19 = scalar_lea.hbm %s783_s0, 256 }
  0x16   :  { %p537_p8 = scmp.ne.s32.totalorder %s783_s0, %s536_s19  ;;  %p540_p9 = scmp.lt.u32.totalorder %s536_s19, %s783_s0 }
  0x18   :  { %p542_p10 = pnand %p540_p9, %p537_p8 }
  0x1a   :  { %545 = shalt.err (!%p542_p10)
}
  0x1b   :  { %s546_s24 = scalar_lea.vmem %s679_s27, 256  ;;  %p551_p12 = scmp.lt.s32.totalorder %s679_s27, %s679_s27 }
  0x1c   :  { %p547_p11 = scmp.ne.s32.totalorder %s679_s27, %s546_s24  ;;  %p552_p13 = scmp.lt.s32.totalorder %s546_s24, %s546_s24 }
  0x1e   :  { %p553_p0 = por %p552_p13, %p551_p12 }
  0x20   :  { %p554_p1 = pnand %p553_p0, %p547_p11 }
  0x22   :  { %557 = shalt.err (!%p554_p1)
}
  0x23   :  { %27 = dma.hbm_to_vmem [thread:$0]  %s783_s0, 256, %s679_s27, [#allocation3], %s634_s13, %s634_s13, %s635_s14  }
  0x24   :  { %s636_s26 = smov [#allocation7]   ;;  %s637_s29 = smov [#allocation8]  }
  0x25   :  { %s47_s28 = sshll.u32 %s636_s26, 4  ;;  %s61_s30 = sshll.u32 %s637_s29, 4  ;;  %s48_s28 = int_to_ptr.vmem [resolvable:$true] %s47_s28  ;;  %s716_s30 = int_to_ptr.vmem [resolvable:$true] %s61_s30 }
  0x26   :  { %s558_s10 = scalar_lea.hbm %s786_s3, 1024 }
  0x27   :  { %p559_p2 = scmp.ne.s32.totalorder %s786_s3, %s558_s10  ;;  %p562_p3 = scmp.lt.u32.totalorder %s558_s10, %s786_s3 }
  0x29   :  { %p564_p4 = pnand %p562_p3, %p559_p2 }
  0x2b   :  { %567 = shalt.err (!%p564_p4)
}
  0x2c   :  { %s568_s0 = scalar_lea.vmem %s48_s28, 1024  ;;  %p573_p6 = scmp.lt.s32.totalorder %s48_s28, %s48_s28 }
  0x2d   :  { %p569_p5 = scmp.ne.s32.totalorder %s48_s28, %s568_s0  ;;  %p574_p7 = scmp.lt.s32.totalorder %s568_s0, %s568_s0 }
  0x2f   :  { %p575_p8 = por %p574_p7, %p573_p6 }
  0x31   :  { %p576_p9 = pnand %p575_p8, %p569_p5 }
  0x33   :  { %579 = shalt.err (!%p576_p9)
}
  0x34   :  { %53 = dma.hbm_to_vmem [thread:$0]  %s786_s3, 1024, %s48_s28, [#allocation6], %s634_s13, %s634_s13, %s635_s14  }
  0x35   :  { %s580_s20 = scalar_lea.hbm %s788_s5, 1024 }
  0x36   :  { %p581_p10 = scmp.ne.s32.totalorder %s788_s5, %s580_s20  ;;  %p584_p11 = scmp.lt.u32.totalorder %s580_s20, %s788_s5 }
  0x38   :  { %p586_p12 = pnand %p584_p11, %p581_p10 }
  0x3a   :  { %589 = shalt.err (!%p586_p12)
}
  0x3b   :  { %s590_s1 = scalar_lea.vmem %s716_s30, 1024  ;;  %p595_p0 = scmp.lt.s32.totalorder %s716_s30, %s716_s30 }
  0x3c   :  { %p591_p13 = scmp.ne.s32.totalorder %s716_s30, %s590_s1  ;;  %p596_p1 = scmp.lt.s32.totalorder %s590_s1, %s590_s1 }
  0x3e   :  { %p597_p2 = por %p596_p1, %p595_p0 }
  0x40   :  { %p598_p3 = pnand %p597_p2, %p591_p13 }
  0x42   :  { %601 = shalt.err (!%p598_p3)
}
  0x43   :  { %67 = dma.hbm_to_vmem [thread:$0]  %s788_s5, 1024, %s716_s30, [#allocation9], %s634_s13, %s634_s13, %s635_s14  }
  0x44   :  { %624 = dma.done.wait [#allocation3], 256  }
  0x45   :  { %625 = vsyncadd [#allocation3], 4294967040 }
  0x46   :  { %626 = dma.done.wait [#allocation6], 1280  }
  0x47   :  { %627 = vsyncadd [#allocation6], 4294966016 }
  0x48   :  { %628 = dma.done.wait [#allocation9], 1024  }
  0x49   :  { %629 = vsyncadd [#allocation9], 4294966272  ;;  %vm93_vm0 = vcmask 130048   ;;  %v84_v0 = vld [vmem:[#allocation5] sm:$0xff]  ;;  %v85_v1 = vld [vmem:[#allocation5 + $0x8] sm:$0xff]  ;;  %vm192_vm1 = vcmask 523264  }
  0x4a   :  { %v82_v2 = vld [vmem:[#allocation2] sm:$0xff]  ;;  %v471_v3 = vpack.c.bf16 %v85_v1, %v84_v0  ;;  %v178_v5 = vld [vmem:[#allocation7 + $0x8] sm:$0xff]  ;;  %v179_v7 = vld [vmem:[#allocation7 + $0x10] sm:$0xff]  ;;  %s638_s8 = smov [#allocation10]  }
  0x4b   :  { %430 = vmatprep.mubr.msk.f32.mxu0 %vm93_vm0, %v82_v2  ;;  %v177_v4 = vld [vmem:[#allocation7] sm:$0xff]  ;;  %v180_v8 = vld [vmem:[#allocation7 + $0x18] sm:$0xff]  ;;  %v182_v11 = vld [vmem:[#allocation7 + $0x28] sm:$0xff]  ;;  %s379_s9 = sshll.u32 %s638_s8, 4  ;;  %s380_s9 = int_to_ptr.vmem [resolvable:$true] %s379_s9 }
  0x4c   :  { %v475_v6 = vpack.c.bf16 %v178_v5, %v177_v4  ;;  %472 = vmatprep.subr.bf16.mxu0 %v471_v3  ;;  %v479_v9 = vpack.c.bf16 %v180_v8, %v179_v7  ;;  %v181_v10 = vld [vmem:[#allocation7 + $0x20] sm:$0xff]  ;;  %v83_v12 = vld [vmem:[#allocation2 + $0x8] sm:$0xff]  ;;  %v183_v14 = vld [vmem:[#allocation7 + $0x30] sm:$0xff]  ;;  %p607_p5 = scmp.lt.s32.totalorder %s380_s9, %s380_s9 }
  0x4d   :  { %474 = vmatpush3.bf16.msra.mxu0 %v471_v3  ;;  %v483_v13 = vpack.c.bf16 %v182_v11, %v181_v10  ;;  %v184_v15 = vld [vmem:[#allocation7 + $0x38] sm:$0xff]  ;;  %v276_v17 = vld [vmem:[#allocation8] sm:$0xff]  ;;  %v277_v18 = vld [vmem:[#allocation8 + $0x8] sm:$0xff] }
  0x4e   :  { %476 = vmatprep.subr.bf16.mxu1 %v475_v6  ;;  %v487_v16 = vpack.c.bf16 %v184_v15, %v183_v14  ;;  %v278_v19 = vld [vmem:[#allocation8 + $0x10] sm:$0xff]  ;;  %v491_v20 = vpack.c.bf16 %v277_v18, %v276_v17  ;;  %v279_v21 = vld [vmem:[#allocation8 + $0x18] sm:$0xff]  ;;  %v280_v23 = vld [vmem:[#allocation8 + $0x20] sm:$0xff] }
  0x4f   :  { %478 = vmatpush3.bf16.msra.mxu1 %v475_v6  ;;  %v495_v22 = vpack.c.bf16 %v279_v21, %v278_v19  ;;  %v281_v24 = vld [vmem:[#allocation8 + $0x28] sm:$0xff]  ;;  %v393_v26 = vld [vmem:[%s785_s2] ss:$0 sm:$0xff]  ;;  %v282_v33 = vld [vmem:[#allocation8 + $0x30] sm:$0xff] }
  0x50   :  { %480 = vmatprep.subr.bf16.mxu1 %v479_v9  ;;  %431 = vmatmul.mubr.msk.f32.vlgmr.msra.gmra.mrb[0].mxu0 %vm93_vm0, %v83_v12  ;;  %v499_v25 = vpack.c.bf16 %v281_v24, %v280_v23  ;;  %v283_v34 = vld [vmem:[#allocation8 + $0x38] sm:$0xff]  ;;  %v396_v36 = vld [vmem:[%s787_s4] ss:$0 sm:$0xff]  ;;  %s602_s4 = scalar_lea.vmem %s380_s9, 256 }
  0x51   :  { %492 = vmatprep.subr.bf16.mxu0 %v491_v20  ;;  %v503_v35 = vpack.c.bf16 %v283_v34, %v282_v33  ;;  %v399_v43 = vld [vmem:[%s789_s6] ss:$0 sm:$0xff]  ;;  %p603_p4 = scmp.ne.s32.totalorder %s380_s9, %s602_s4  ;;  %p608_p6 = scmp.lt.s32.totalorder %s602_s4, %s602_s4 }
  0x52   :  { %494 = vmatpush3.bf16.msra.mxu0 %v491_v20 }
  0x53   :  { %482 = vmatpush3.bf16.msra.mxu1 %v479_v9  ;;  %496 = vmatprep.subr.bf16.mxu0 %v495_v22  ;;  %p609_p7 = por %p608_p6, %p607_p5 }
  0x54   :  { %484 = vmatprep.subr.bf16.mxu1 %v483_v13 }
  0x55   :  { %p610_p8 = pnand %p609_p7, %p603_p4 }
  0x56   :  { %498 = vmatpush3.bf16.msra.mxu0 %v495_v22 }
  0x57   :  { %486 = vmatpush3.bf16.msra.mxu1 %v483_v13  ;;  %500 = vmatprep.subr.bf16.mxu0 %v499_v25 }
  0x58   :  { %488 = vmatprep.subr.bf16.mxu1 %v487_v16 }
  0x5a   :  { %502 = vmatpush3.bf16.msra.mxu0 %v499_v25 }
  0x5b   :  { %490 = vmatpush3.bf16.msra.mxu1 %v487_v16  ;;  %504 = vmatprep.subr.bf16.mxu0 %v503_v35 }
  0x5e   :  { %506 = vmatpush3.bf16.msra.mxu0 %v503_v35 }
 0x123   :  { %v432_v27 = vpop.f32.mrb[0].mxu0 }
 0x124   :  { %v172_v28 = vadd.f32 %v432_v27, %v393_v26  ;;  %v166_v29 = vpop.f32.mrb[1].mxu0 }
 0x125   :  { %v167_v30 = vadd.f32 %v393_v26, %v166_v29 }
 0x126   :  { %v176_v32 = vmax.f32 %v172_v28, 0.0 }
 0x127   :  { %v175_v31 = vmax.f32 %v167_v30, 0.0 }
 0x129   :  { %449 = vmatprep.mubr.msk.f32.mxu1 %vm192_vm1, %v175_v31 }
 0x12a   :  { %450 = vmatmul.mubr.msk.f32.vlgmr.msra.gmra.mrb[0].mxu1 %vm192_vm1, %v176_v32 }
 0x1fd   :  { %v451_v37 = vpop.f32.mrb[0].mxu1 }
 0x1fe   :  { %v271_v38 = vadd.f32 %v451_v37, %v396_v36  ;;  %v265_v39 = vpop.f32.mrb[1].mxu1 }
 0x1ff   :  { %v266_v40 = vadd.f32 %v396_v36, %v265_v39 }
 0x200   :  { %v275_v42 = vmax.f32 %v271_v38, 0.0 }
 0x201   :  { %v274_v41 = vmax.f32 %v266_v40, 0.0 }
 0x203   :  { %468 = vmatprep.mubr.msk.f32.mxu0 %vm192_vm1, %v274_v41 }
 0x204   :  { %469 = vmatmul.mubr.msk.f32.vlgmr.msra.gmra.mrb[2].mxu0 %vm192_vm1, %v275_v42 }
 0x2d7   :  { %v470_v44 = vpop.f32.mrb[2].mxu0 }
 0x2d8   :  { %v369_v45 = vadd.f32 %v470_v44, %v399_v43  ;;  %v363_v46 = vpop.f32.mrb[3].mxu0 }
 0x2d9   :  { %v364_v47 = vadd.f32 %v399_v43, %v363_v46 }
 0x2da   :  { %373 = vst [vmem:[#allocation10 + $0x8] sm:$0xff] %v369_v45 }
 0x2db   :  { %372 = vst [vmem:[#allocation10] sm:$0xff] %v364_v47 }
 0x2dc   :  { %613 = shalt.err (!%p610_p8)
}
 0x2dd   :  { %s614_s6 = scalar_lea.hbm %s790_s7, 256 }
 0x2de   :  { %p615_p9 = scmp.ne.s32.totalorder %s790_s7, %s614_s6  ;;  %p618_p10 = scmp.lt.u32.totalorder %s614_s6, %s790_s7 }
 0x2e0   :  { %p620_p11 = pnand %p618_p10, %p615_p9 }
 0x2e2   :  { %623 = shalt.err (!%p620_p11)
}
 0x2e3   :  { %385 = dma.vmem_to_hbm [thread:$0]  %s380_s9, 256, %s790_s7, [#allocation4], %s634_s13, %s634_s13, %s635_s14  }
 0x2e4   :  { %630 = dma.done.wait [#allocation4], 256  }
 0x2e5   :  { %631 = vsyncadd [#allocation4], 4294967040 }
 0x2e6   :  { %389 = vsyncpa [#allocation3], 1 }
 0x2e7   :  { %390 = vsyncpa [#allocation6], 1 }
 0x2e8   :  { %391 = vsyncpa [#allocation9], 1 }
 0x2e9   :  { %392 = vsyncpa [#allocation4], 1 }

</bundles_post_ra>
